<compile_context>
chip_gen: v7x
topology: tpu7x:2x2x1
jax: 0.10.0
libtpu: 0.0.40
codegen_flags: <defaults>
</compile_context>

<pallas_src>
import jax
import jax.numpy as jnp
from jax.experimental import pallas as pl
from jax.experimental.pallas import tpu as pltpu


def _kmer_embed_kernel(kmer_ref, table_ref, out_ref):
    # kmer_ref : (TN, n_features)                       int32
    # table_ref: (n_features*C_in, n_features*C_out)    float32, block-diagonal
    # out_ref  : (TN, n_features*C_out)                 float32
    tn, n_features = kmer_ref.shape
    big_cin = table_ref.shape[0]
    c_in = big_cin // n_features

    idx = kmer_ref[...]                                              # (TN, n_features)
    cols = jax.lax.broadcasted_iota(jnp.int32, (tn, big_cin), 1)     # (TN, nf*C_in)

    # Multi-hot: row r has a 1 at column p*C_in + kmer[r, p] for every position p.
    multi_hot = jnp.zeros((tn, big_cin), dtype=table_ref.dtype)
    for p in range(n_features):                                      # static unroll (nf is tiny)
        multi_hot += (cols == (idx[:, p:p + 1] + p * c_in)).astype(table_ref.dtype)

    # One MXU matmul against the block-diagonal table yields the already
    # concatenated embedding row [emb(k_0) | emb(k_1) | ...]; single full store.
    out_ref[...] = jnp.dot(multi_hot, table_ref[...],
                           preferred_element_type=jnp.float32).astype(out_ref.dtype)


def kmer_multiple_embedding(x: dict, embedding_table: jax.Array,
                            num_neighboring_features: int = 1,
                            row_block: int = 512) -> dict:
    """Pallas implementation of KmerMultipleEmbedding.forward.

    x["kmer"] : integer array with trailing dim n_features = 2*nnf + 1
    x["X"]    : signal features, returned unchanged
    embedding_table : (input_channel, output_channel) float weights
    """
    n_features = 2 * num_neighboring_features + 1
    c_in, c_out = embedding_table.shape

    X = x["X"]                                          # passthrough, no kernel traffic
    kmer = x["kmer"].astype(jnp.int32).reshape(-1, n_features)   # view-only flatten
    n_rows = kmer.shape[0]

    # Row-block size: large for throughput, shrunk (to a sublane multiple) for tiny inputs.
    tn = row_block
    if n_rows <= tn:
        tn = max(8, ((n_rows + 7) // 8) * 8)
    n_pad = pl.cdiv(n_rows, tn) * tn
    if n_pad != n_rows:
        kmer = jnp.pad(kmer, ((0, n_pad - n_rows), (0, 0)))   # index 0 is always valid

    # Block-diagonal table: (n_features*C_in, n_features*C_out). Small, built host-side.
    big_table = jnp.zeros((n_features * c_in, n_features * c_out), embedding_table.dtype)
    for p in range(n_features):
        big_table = big_table.at[p * c_in:(p + 1) * c_in,
                                 p * c_out:(p + 1) * c_out].set(embedding_table)

    emb = pl.pallas_call(
        _kmer_embed_kernel,
        out_shape=jax.ShapeDtypeStruct((n_pad, n_features * c_out), embedding_table.dtype),
        grid=(n_pad // tn,),
        in_specs=[
            pl.BlockSpec((tn, n_features), lambda i: (i, 0)),                 # kmer row-block
            pl.BlockSpec((n_features * c_in, n_features * c_out),
                         lambda i: (0, 0)),                                   # full table, resident
        ],
        out_specs=pl.BlockSpec((tn, n_features * c_out), lambda i: (i, 0)),
        compiler_params=pltpu.CompilerParams(
            dimension_semantics=("parallel",),
        ),
    )(kmer, big_table)

    if n_pad != n_rows:
        emb = emb[:n_rows]

    # TODO(synk): output lane width is n_features*output_channel (96 here), which is
    # dictated by module semantics and stays <128 lanes; padding it to 128 would need
    # an extra wrapper-side copy, so it is left as-is.
    return {"X": X, "kmer": emb}


if __name__ == "__main__":
    key = jax.random.PRNGKey(0)
    kk, kx, kt = jax.random.split(key, 3)

    # Small shapes consistent with the module.
    input_channel = 64          # number of unique 5-mer motifs
    output_channel = 32         # embedding dimension
    num_neighboring_features = 1
    n_features = 2 * num_neighboring_features + 1     # 3

    n_sites = 16
    kmer = jax.random.randint(kk, (n_sites, n_features), 0, input_channel, dtype=jnp.int32)
    X = jax.random.normal(kx, (n_sites, 3 * n_features), dtype=jnp.float32)   # signal features
    table = jax.random.normal(kt, (input_channel, output_channel), dtype=jnp.float32)

    out = kmer_multiple_embedding({"X": X, "kmer": kmer}, table,
                                  num_neighboring_features=num_neighboring_features)
    jax.block_until_ready(out["kmer"])

    # Reference: nn.Embedding(kmer).reshape(-1, n_features * output_channel)
    ref_kmer = jnp.take(table, kmer, axis=0).reshape(-1, n_features * output_channel)

    assert out["X"] is X                                            # true passthrough, no copy
    assert out["kmer"].shape == (n_sites, n_features * output_channel)
    assert out["kmer"].dtype == table.dtype
    assert jnp.allclose(out["kmer"], ref_kmer, atol=1e-5, rtol=1e-5)

    print("KERNEL_OK")
</pallas_src>

<mosaic_0001>
module attributes {stable_mosaic.version = 11 : i64} {
  func.func @_kmer_embed_kernel(%arg0: i32, %arg1: memref<16x3xi32, #tpu.memory_space<vmem>>, %arg2: memref<192x96xf32, #tpu.memory_space<vmem>>, %arg3: memref<16x96xf32, #tpu.memory_space<vmem>>) attributes {dimension_semantics = [#tpu.dimension_semantics<parallel>], iteration_bounds = array<i64: 1>, scalar_prefetch = 0 : i64, scratch_operands = 0 : i64, tpu.core_type = #tpu.core_type<tc>, window_params = [{transform_indices = @transform_0, window_bounds = array<i64: 16, 3>}, {pipeline_mode = #tpu.pipeline_mode<synchronous>, transform_indices = @transform_1, window_bounds = array<i64: 192, 96>}, {transform_indices = @transform_2, window_bounds = array<i64: 16, 96>}]} {
    %c0 = arith.constant 0 : index
    %c0_0 = arith.constant 0 : index
    %0 = vector.load %arg1[%c0, %c0_0] : memref<16x3xi32, #tpu.memory_space<vmem>>, vector<16x3xi32>
    %1 = tpu.iota {dimensions = array<i32: 1>} : vector<16x192xi32>
    %cst = arith.constant 0.000000e+00 : f32
    %2 = vector.broadcast %cst : f32 to vector<16x192xf32>
    %3 = vector.extract_strided_slice %0 {offsets = [0, 0], sizes = [16, 1], strides = [1, 1]} : vector<16x3xi32> to vector<16x1xi32>
    %c0_i32 = arith.constant 0 : i32
    %4 = vector.broadcast %c0_i32 : i32 to vector<16x1xi32>
    %5 = arith.addi %3, %4 : vector<16x1xi32>
    %6 = vector.broadcast %5 : vector<16x1xi32> to vector<16x192xi32>
    %7 = arith.cmpi eq, %1, %6 : vector<16x192xi32>
    %8 = arith.extui %7 : vector<16x192xi1> to vector<16x192xi32>
    %9 = arith.sitofp %8 : vector<16x192xi32> to vector<16x192xf32>
    %10 = arith.addf %2, %9 : vector<16x192xf32>
    %11 = vector.extract_strided_slice %0 {offsets = [0, 1], sizes = [16, 1], strides = [1, 1]} : vector<16x3xi32> to vector<16x1xi32>
    %c64_i32 = arith.constant 64 : i32
    %12 = vector.broadcast %c64_i32 : i32 to vector<16x1xi32>
    %13 = arith.addi %11, %12 : vector<16x1xi32>
    %14 = vector.broadcast %13 : vector<16x1xi32> to vector<16x192xi32>
    %15 = arith.cmpi eq, %1, %14 : vector<16x192xi32>
    %16 = arith.extui %15 : vector<16x192xi1> to vector<16x192xi32>
    %17 = arith.sitofp %16 : vector<16x192xi32> to vector<16x192xf32>
    %18 = arith.addf %10, %17 : vector<16x192xf32>
    %19 = vector.extract_strided_slice %0 {offsets = [0, 2], sizes = [16, 1], strides = [1, 1]} : vector<16x3xi32> to vector<16x1xi32>
    %c128_i32 = arith.constant 128 : i32
    %20 = vector.broadcast %c128_i32 : i32 to vector<16x1xi32>
    %21 = arith.addi %19, %20 : vector<16x1xi32>
    %22 = vector.broadcast %21 : vector<16x1xi32> to vector<16x192xi32>
    %23 = arith.cmpi eq, %1, %22 : vector<16x192xi32>
    %24 = arith.extui %23 : vector<16x192xi1> to vector<16x192xi32>
    %25 = arith.sitofp %24 : vector<16x192xi32> to vector<16x192xf32>
    %26 = arith.addf %18, %25 : vector<16x192xf32>
    %c0_1 = arith.constant 0 : index
    %c0_2 = arith.constant 0 : index
    %27 = vector.load %arg2[%c0_1, %c0_2] : memref<192x96xf32, #tpu.memory_space<vmem>>, vector<192x96xf32>
    %cst_3 = arith.constant dense<0.000000e+00> : vector<16x96xf32>
    %28 = tpu.matmul %26, %27, %cst_3 {dimension_numbers = #tpu.dot_dimension_numbers<[1], [0], [0], [1], [0, 0, 1, 1], [], []>} : vector<16x192xf32>, vector<192x96xf32>, vector<16x96xf32> -> vector<16x96xf32>
    %c0_4 = arith.constant 0 : index
    %c0_5 = arith.constant 0 : index
    %29 = vector.load %arg3[%c0_4, %c0_5] : memref<16x96xf32, #tpu.memory_space<vmem>>, vector<16x96xf32>
    tpu.vector_store %arg3[%c0_4, %c0_5], %28 {strides = array<i32>} : memref<16x96xf32, #tpu.memory_space<vmem>>, vector<16x96xf32>,
    return
  }
  func.func @transform_0(%arg0: i32) -> (i32, i32) {
    %c0_i32 = arith.constant 0 : i32
    %c0_i32_0 = arith.constant 0 : i32
    return %arg0, %c0_i32 : i32, i32
  }
  func.func @transform_1(%arg0: i32) -> (i32, i32) {
    %c0_i32 = arith.constant 0 : i32
    %c0_i32_0 = arith.constant 0 : i32
    %c0_i32_1 = arith.constant 0 : i32
    return %c0_i32, %c0_i32_0 : i32, i32
  }
  func.func @transform_2(%arg0: i32) -> (i32, i32) {
    %c0_i32 = arith.constant 0 : i32
    %c0_i32_0 = arith.constant 0 : i32
    return %arg0, %c0_i32 : i32, i32
  }
}

</mosaic_0001>

<bundles_post_ra>
// kernel: tpu_custom_call.1
= control target key start
LH: loop header
LB: loop body
LE: loop exit
PB: predicated region body
PF: predicated region fallthrough
CT: control target
= control target key end

     0   :  { %7 = vsyncpa [#allocation3], 0  ;;  %s448_s0 = inlined_call_operand.vmem [shape: s32[16,3], index: 0, kind: input, shape index: {}]   ;;  %s449_s1 = inlined_call_operand.hbm [shape: f32[192,96], index: 1, kind: input, shape index: {}]   ;;  %s450_s2 = inlined_call_operand.hbm [shape: f32[16,96], index: 2, kind: output, shape index: {}]  }
   0x1   :  { %8 = vsyncpa [#allocation4], 0  ;;  %s362_s9 = smov [#allocation2]   ;;  %s314_s13 = scalar_lea.hbm %s449_s1, 3072 }
   0x2   :  { %s16_s10 = sshll.u32 %s362_s9, 4  ;;  %p315_p0 = scmp.ne.s32.totalorder %s449_s1, %s314_s13  ;;  %s17_s10 = int_to_ptr.vmem [resolvable:$true] %s16_s10 }
   0x3   :  { %p318_p1 = scmp.lt.u32.totalorder %s314_s13, %s449_s1 }
   0x5   :  { %p320_p2 = pnand %p318_p1, %p315_p0 }
   0x7   :  { %323 = shalt.err (!%p320_p2)
}
   0x8   :  { %s324_s18 = scalar_lea.vmem %s17_s10, 3072  ;;  %p329_p4 = scmp.lt.s32.totalorder %s17_s10, %s17_s10 }
   0x9   :  { %p325_p3 = scmp.ne.s32.totalorder %s17_s10, %s324_s18  ;;  %p330_p5 = scmp.lt.s32.totalorder %s324_s18, %s324_s18 }
   0xb   :  { %p331_p6 = por %p330_p5, %p329_p4 }
   0xd   :  { %p332_p7 = pnand %p331_p6, %p325_p3 }
   0xf   :  { %335 = shalt.err (!%p332_p7)
}
  0x10   :  { %s363_s19 = smov 128   ;;  %s364_s20 = smov 8  }
  0x11   :  { %22 = dma.hbm_to_vmem [thread:$0]  %s449_s1, 3072, %s17_s10, [#allocation3], %s363_s19, %s363_s19, %s364_s20  }
  0x12   :  { %358 = dma.done.wait [#allocation3], 3072  }
  0x13   :  { %359 = vsyncadd [#allocation3], 4294964224  ;;  %v365_v0 = vmov 0   ;;  %v366_v1 = vmov 1   ;;  %v367_v2 = vmov 0.0|0.0   ;;  %v26_v3 = vld [vmem:[%s448_s0] sm:$0xff]  ;;  %v28_v46 = vlaneseq }
  0x14   :  { %310 = vset.pattern.permute.xlu0 %v365_v0  ;;  %311 = vset.pattern.permute.xlu1 %v366_v1  ;;  %v27_v4 = vld [vmem:[%s448_s0 + $0x8] sm:$0xff]  ;;  %v101_v5 = vld [vmem:[#allocation2] sm:$0xff]  ;;  %v53_v6 = vadd.s32 64, %v26_v3  ;;  %v103_v8 = vld [vmem:[#allocation2 + $0x10] sm:$0xff]  ;;  %v77_v15 = vadd.s32 128, %v26_v3  ;;  %v368_v18 = vmov 2  }
  0x15   :  { %241 = vmatprep.subr.bf16.mxu0 %v367_v2  ;;  %277 = vmatprep.subr.bf16.mxu1 %v367_v2  ;;  %v102_v7 = vld [vmem:[#allocation2 + $0x8] sm:$0xff]  ;;  %v104_v10 = vld [vmem:[#allocation2 + $0x18] sm:$0xff]  ;;  %v54_v11 = vadd.s32 64, %v27_v4  ;;  %v105_v13 = vld [vmem:[#allocation2 + $0x20] sm:$0xff]  ;;  %v78_v16 = vadd.s32 128, %v27_v4  ;;  %v29_v47 = vand.u32 127, %v28_v46 }
  0x16   :  { %32 = vperm.xlu0 %310, %v26_v3   ;;  %v242_v9 = vpack.c.bf16 %v102_v7, %v101_v5  ;;  %56 = vperm.xlu1 %311, %v53_v6   ;;  %v245_v12 = vpack.c.bf16 %v104_v10, %v103_v8  ;;  %v106_v14 = vld [vmem:[#allocation2 + $0x28] sm:$0xff]  ;;  %v107_v19 = vld [vmem:[#allocation2 + $0x30] sm:$0xff]  ;;  %v108_v20 = vld [vmem:[#allocation2 + $0x38] sm:$0xff]  ;;  %v369_v52 = vmov 0.0   ;;  %vm125_vm8 = vcmask 523264   ;;  %s370_s0 = smov [#allocation5]  }
  0x17   :  { %v248_v17 = vpack.c.bf16 %v106_v14, %v105_v13  ;;  %v251_v21 = vpack.c.bf16 %v108_v20, %v107_v19  ;;  %v109_v22 = vld [vmem:[#allocation2 + $0x40] sm:$0xff]  ;;  %v110_v23 = vld [vmem:[#allocation2 + $0x48] sm:$0xff]  ;;  %v111_v25 = vld [vmem:[#allocation2 + $0x50] sm:$0xff]  ;;  %v30_v48 = vadd.s32 128, %v29_v47  ;;  %vm207_vm13 = vcmask 785408   ;;  %s215_s1 = sshll.u32 %s370_s0, 4  ;;  %s216_s1 = int_to_ptr.vmem [resolvable:$true] %s215_s1 }
  0x18   :  { %243 = vmatpush1.bf16.msra.mxu0 %v242_v9  ;;  %289 = vmatpush1.bf16.msra.mxu1 %v242_v9  ;;  %v254_v24 = vpack.c.bf16 %v110_v23, %v109_v22  ;;  %v112_v26 = vld [vmem:[#allocation2 + $0x58] sm:$0xff]  ;;  %v113_v28 = vld [vmem:[#allocation2 + $0x60] sm:$0xff]  ;;  %v114_v29 = vld [vmem:[#allocation2 + $0x68] sm:$0xff]  ;;  %s336_s27 = scalar_lea.vmem %s216_s1, 256  ;;  %p341_p9 = scmp.lt.s32.totalorder %s216_s1, %s216_s1 }
  0x19   :  { %244 = vmatprep.subr.bf16.mxu0 %v367_v2  ;;  %278 = vmatprep.subr.bf16.mxu1 %v367_v2  ;;  %v257_v27 = vpack.c.bf16 %v112_v26, %v111_v25  ;;  %v260_v30 = vpack.c.bf16 %v114_v29, %v113_v28  ;;  %v115_v31 = vld [vmem:[#allocation2 + $0x70] sm:$0xff]  ;;  %v116_v32 = vld [vmem:[#allocation2 + $0x78] sm:$0xff]  ;;  %v117_v34 = vld [vmem:[#allocation2 + $0x80] sm:$0xff]  ;;  %p337_p8 = scmp.ne.s32.totalorder %s216_s1, %s336_s27  ;;  %p342_p10 = scmp.lt.s32.totalorder %s336_s27, %s336_s27 }
  0x1a   :  { %35 = vperm.xlu0 %310, %v27_v4   ;;  %59 = vperm.xlu1 %311, %v54_v11   ;;  %v263_v33 = vpack.c.bf16 %v116_v32, %v115_v31  ;;  %v118_v35 = vld [vmem:[#allocation2 + $0x88] sm:$0xff]  ;;  %v119_v37 = vld [vmem:[#allocation2 + $0x90] sm:$0xff]  ;;  %v120_v38 = vld [vmem:[#allocation2 + $0x98] sm:$0xff] }
  0x1b   :  { %v266_v36 = vpack.c.bf16 %v118_v35, %v117_v34  ;;  %v269_v39 = vpack.c.bf16 %v120_v38, %v119_v37  ;;  %v121_v40 = vld [vmem:[#allocation2 + $0xa0] sm:$0xff]  ;;  %v122_v41 = vld [vmem:[#allocation2 + $0xa8] sm:$0xff]  ;;  %v123_v43 = vld [vmem:[#allocation2 + $0xb0] sm:$0xff]  ;;  %p343_p11 = por %p342_p10, %p341_p9 }
  0x1c   :  { %246 = vmatpush1.bf16.msra.mxu0 %v245_v12  ;;  %290 = vmatpush1.bf16.msra.mxu1 %v245_v12  ;;  %v272_v42 = vpack.c.bf16 %v122_v41, %v121_v40  ;;  %v124_v44 = vld [vmem:[#allocation2 + $0xb8] sm:$0xff] }
  0x1d   :  { %247 = vmatprep.subr.bf16.mxu0 %v367_v2  ;;  %279 = vmatprep.subr.bf16.mxu1 %v367_v2  ;;  %v275_v45 = vpack.c.bf16 %v124_v44, %v123_v43  ;;  %p344_p12 = pnand %p343_p11, %p337_p8 }
  0x1e   :  { %312 = vset.pattern.permute.xlu0 %v368_v18  ;;  %313 = vset.pattern.permute.xlu1 %v368_v18 }
  0x1f   :  { %80 = vperm.xlu0 %312, %v77_v15   ;;  %83 = vperm.xlu1 %313, %v78_v16  }
  0x20   :  { %249 = vmatpush1.bf16.msra.mxu0 %v248_v17  ;;  %291 = vmatpush1.bf16.msra.mxu1 %v248_v17 }
  0x21   :  { %250 = vmatprep.subr.bf16.mxu0 %v367_v2  ;;  %280 = vmatprep.subr.bf16.mxu1 %v367_v2 }
  0x24   :  { %252 = vmatpush1.bf16.msra.mxu0 %v251_v21  ;;  %292 = vmatpush1.bf16.msra.mxu1 %v251_v21 }
  0x25   :  { %253 = vmatprep.subr.bf16.mxu0 %v367_v2  ;;  %281 = vmatprep.subr.bf16.mxu1 %v367_v2 }
  0x28   :  { %255 = vmatpush1.bf16.msra.mxu0 %v254_v24  ;;  %293 = vmatpush1.bf16.msra.mxu1 %v254_v24 }
  0x29   :  { %256 = vmatprep.subr.bf16.mxu0 %v367_v2  ;;  %282 = vmatprep.subr.bf16.mxu1 %v367_v2 }
  0x2c   :  { %258 = vmatpush1.bf16.msra.mxu0 %v257_v27  ;;  %294 = vmatpush1.bf16.msra.mxu1 %v257_v27 }
  0x2d   :  { %259 = vmatprep.subr.bf16.mxu0 %v367_v2  ;;  %283 = vmatprep.subr.bf16.mxu1 %v367_v2 }
  0x30   :  { %261 = vmatpush1.bf16.msra.mxu0 %v260_v30  ;;  %295 = vmatpush1.bf16.msra.mxu1 %v260_v30 }
  0x31   :  { %262 = vmatprep.subr.bf16.mxu0 %v367_v2  ;;  %284 = vmatprep.subr.bf16.mxu1 %v367_v2 }
  0x34   :  { %264 = vmatpush1.bf16.msra.mxu0 %v263_v33  ;;  %296 = vmatpush1.bf16.msra.mxu1 %v263_v33 }
  0x35   :  { %265 = vmatprep.subr.bf16.mxu0 %v367_v2  ;;  %285 = vmatprep.subr.bf16.mxu1 %v367_v2 }
  0x38   :  { %267 = vmatpush1.bf16.msra.mxu0 %v266_v36  ;;  %297 = vmatpush1.bf16.msra.mxu1 %v266_v36 }
  0x39   :  { %268 = vmatprep.subr.bf16.mxu0 %v367_v2  ;;  %286 = vmatprep.subr.bf16.mxu1 %v367_v2 }
  0x3c   :  { %270 = vmatpush1.bf16.msra.mxu0 %v269_v39  ;;  %298 = vmatpush1.bf16.msra.mxu1 %v269_v39 }
  0x3d   :  { %271 = vmatprep.subr.bf16.mxu0 %v367_v2  ;;  %287 = vmatprep.subr.bf16.mxu1 %v367_v2 }
  0x40   :  { %273 = vmatpush1.bf16.msra.mxu0 %v272_v42  ;;  %299 = vmatpush1.bf16.msra.mxu1 %v272_v42 }
  0x41   :  { %274 = vmatprep.subr.bf16.mxu0 %v367_v2  ;;  %288 = vmatprep.subr.bf16.mxu1 %v367_v2 }
  0x44   :  { %276 = vmatpush1.bf16.msra.mxu0 %v275_v45  ;;  %300 = vmatpush1.bf16.msra.mxu1 %v275_v45 }
  0x95   :  { %v33_v49 = vpop.permute.xlu0 %32  ;;  %v57_v50 = vpop.permute.xlu1 %56 }
  0x96   :  { %vm37_vm0 = vcmp.eq.s32.totalorder %v29_v47, %v33_v49  ;;  %vm38_vm1 = vcmp.eq.s32.totalorder %v30_v48, %v33_v49  ;;  %vm61_vm2 = vcmp.eq.s32.totalorder %v29_v47, %v57_v50  ;;  %vm62_vm3 = vcmp.eq.s32.totalorder %v30_v48, %v57_v50 }
  0x97   :  { %v227_v53 = vsel %vm37_vm0, 1.0, %v369_v52  ;;  %v228_v54 = vsel %vm38_vm1, 1.0, %v369_v52  ;;  %v231_v55 = vsel %vm61_vm2, 1.0, %v369_v52  ;;  %v232_v56 = vsel %vm62_vm3, 1.0, %v369_v52 }
  0x98   :  { %v73_v60 = vadd.f32 %v231_v55, %v227_v53  ;;  %v74_v62 = vadd.f32 %v232_v56, %v228_v54 }
  0x99   :  { %v36_v51 = vpop.permute.xlu0 %35  ;;  %v60_v57 = vpop.permute.xlu1 %59 }
  0x9a   :  { %vm39_vm4 = vcmp.eq.s32.totalorder %v29_v47, %v36_v51  ;;  %vm40_vm5 = vcmp.eq.s32.totalorder %v30_v48, %v36_v51  ;;  %vm63_vm6 = vcmp.eq.s32.totalorder %v29_v47, %v60_v57  ;;  %vm64_vm7 = vcmp.eq.s32.totalorder %v30_v48, %v60_v57 }
  0x9b   :  { %v233_v58 = vsel %vm63_vm6, 1.0, %v369_v52  ;;  %v234_v59 = vsel %vm64_vm7, 1.0, %v369_v52  ;;  %v229_v63 = vsel %vm39_vm4, 1.0, %v369_v52  ;;  %v230_v0 = vsel %vm40_vm5, 1.0, %v369_v52 }
  0x9c   :  { %v75_v1 = vadd.f32 %v233_v58, %v229_v63  ;;  %v76_v5 = vadd.f32 %v234_v59, %v230_v0 }
  0x9e   :  { %v81_v61 = vpop.permute.xlu0 %80  ;;  %v84_v4 = vpop.permute.xlu1 %83 }
  0x9f   :  { %vm85_vm9 = vcmp.eq.s32.totalorder %v29_v47, %v81_v61  ;;  %vm86_vm10 = vcmp.eq.s32.totalorder %v30_v48, %v81_v61  ;;  %vm87_vm11 = vcmp.eq.s32.totalorder %v29_v47, %v84_v4  ;;  %vm88_vm12 = vcmp.eq.s32.totalorder %v30_v48, %v84_v4 }
  0xa0   :  { %v235_v2 = vsel %vm85_vm9, 1.0, %v369_v52  ;;  %v236_v3 = vsel %vm86_vm10, 1.0, %v369_v52  ;;  %v237_v8 = vsel %vm87_vm11, 1.0, %v369_v52  ;;  %v238_v9 = vsel %vm88_vm12, 1.0, %v369_v52 }
  0xa1   :  { %v97_v6 = vadd.f32 %v235_v2, %v73_v60  ;;  %v98_v7 = vadd.f32 %v236_v3, %v74_v62  ;;  %v99_v10 = vadd.f32 %v237_v8, %v75_v1  ;;  %v100_v11 = vadd.f32 %v238_v9, %v76_v5 }
  0xa3   :  { %239 = vmatprep.mubr.msk.f32.mxu0 %vm125_vm8, %v98_v7  ;;  %240 = vmatprep.mubr.msk.f32.mxu1 %vm125_vm8, %v100_v11 }
  0xa4   :  { %197 = vmatmul.mubr.f32.vlgmr.msra.gmra.mrb[0].mxu0 %v97_v6  ;;  %202 = vmatmul.mubr.f32.vlgmr.msra.gmra.mrb[0].mxu1 %v99_v10 }
 0x177   :  { %v198_v12 = vpop.f32.mrb[0].mxu0  ;;  %v203_v14 = vpop.f32.mrb[0].mxu1 }
 0x178   :  { %208 = vst.msk [vmem:[#allocation5] sm:$0xff] %vm207_vm13, %v198_v12  ;;  %v200_v13 = vpop.f32.mrb[1].mxu0  ;;  %209 = vst.msk [vmem:[#allocation5 + $0x8] sm:$0xff] %vm207_vm13, %v203_v14  ;;  %v205_v15 = vpop.f32.mrb[1].mxu1 }
 0x179   :  { %347 = shalt.err (!%p344_p12)
}
 0x17a   :  { %s348_s30 = scalar_lea.hbm %s450_s2, 256 }
 0x17b   :  { %p349_p13 = scmp.ne.s32.totalorder %s450_s2, %s348_s30  ;;  %p352_p0 = scmp.lt.u32.totalorder %s348_s30, %s450_s2 }
 0x17d   :  { %p354_p1 = pnand %p352_p0, %p349_p13 }
 0x17f   :  { %357 = shalt.err (!%p354_p1)
}
 0x180   :  { %221 = dma.vmem_to_hbm [thread:$0]  %s216_s1, 256, %s450_s2, [#allocation4], %s363_s19, %s363_s19, %s364_s20  }
 0x181   :  { %360 = dma.done.wait [#allocation4], 256  }
 0x182   :  { %361 = vsyncadd [#allocation4], 4294967040 }
 0x183   :  { %225 = vsyncpa [#allocation3], 1 }
 0x184   :  { %226 = vsyncpa [#allocation4], 1 }

</bundles_post_ra>
